<compile_context>
chip_gen: v7x
topology: tpu7x:2x2x1
jax: 0.10.0
libtpu: 0.0.40
codegen_flags: <defaults>
</compile_context>

<pallas_src>
import jax
import jax.numpy as jnp
from jax import lax
from jax.experimental import pallas as pl
from jax.experimental.pallas import tpu as pltpu


def _conv_stats_kernel(w_ref, p_ref, y_ref, sum_ref, ssq_ref):
    """Per tile: ReLU -> (C_out,K)@(K,TILE_P) matmul -> accumulate BN stats."""
    p = jnp.maximum(p_ref[0], 0)                                      # ReLU (bf16, VPU)
    y = jnp.dot(w_ref[...], p, preferred_element_type=jnp.float32)    # (C_out, TILE_P) f32
    y_ref[0] = y.astype(y_ref.dtype)                                  # bf16, lane-dense store

    # Single-sweep BN statistics from the f32 accumulator (precision preserved).
    ts = jnp.sum(y, axis=1, keepdims=True)                            # (C_out, 1)
    tq = jnp.sum(y * y, axis=1, keepdims=True)

    @pl.when(pl.program_id(1) == 0)
    def _():
        sum_ref[0] = jnp.zeros_like(ts)
        ssq_ref[0] = jnp.zeros_like(tq)

    sum_ref[0] += ts
    ssq_ref[0] += tq


def _bn_apply_kernel(scale_ref, shift_ref, y_ref, o_ref):
    # Pre-folded scale/shift -> a single multiply-add per element.
    y = y_ref[0].astype(jnp.float32)
    o_ref[0] = (y * scale_ref[...] + shift_ref[...]).astype(o_ref.dtype)


def _im2col_t(x, KH, KW, stride, padding):
    """x: (N, C_in, H, W) -> (N, C_in*KH*KW, H_out*W_out), K order (C_in, kh, kw)."""
    N, C_in, H, W = x.shape
    H_out = (H + 2 * padding - KH) // stride + 1
    W_out = (W + 2 * padding - KW) // stride + 1
    xp = jnp.pad(x, ((0, 0), (0, 0), (padding, padding), (padding, padding)))
    cols = []
    for kh in range(KH):
        for kw in range(KW):
            cols.append(
                xp[:, :, kh:kh + H_out * stride:stride, kw:kw + W_out * stride:stride]
            )  # (N, C_in, H_out, W_out)
    pat = jnp.stack(cols, axis=2)                       # (N, C_in, KH*KW, H_out, W_out)
    pat = pat.reshape(N, C_in * KH * KW, H_out * W_out)
    return pat, H_out, W_out


def _round_up(a, b):
    return ((a + b - 1) // b) * b


def _choose_tile_p(P, K, C_out, tile_p_max, vmem_budget_bytes=24 * 1024 * 1024):
    """Largest lane-dense tile that keeps the double-buffered working set small."""
    # Per output column: bf16 patch block (2 bufs) + bf16 y block (2 bufs).
    per_col = 2 * 2 * K + 2 * 2 * C_out
    fixed = 2 * C_out * K + 4 * 4 * C_out            # resident weight + stat accumulators
    max_cols = max(128, (vmem_budget_bytes - fixed) // max(per_col, 1))
    tile = max(128, (min(tile_p_max, max_cols) // 128) * 128)
    return min(tile, _round_up(P, 128))


def stdconv_forward(x, weight, gamma, beta, *, stride=1, padding=1, eps=1e-5,
                    tile_p=512):
    """StdConv forward.  x: (N, C_in, H, W) NCHW.  weight: (C_out, C_in, KH, KW)."""
    N, C_in, H, W = x.shape
    C_out, _, KH, KW = weight.shape
    K = C_in * KH * KW

    pat, H_out, W_out = _im2col_t(x, KH, KW, stride, padding)
    P = H_out * W_out

    TILE_P = _choose_tile_p(P, K, C_out, tile_p)
    P_pad = _round_up(P, TILE_P)

    pat = pat.astype(jnp.bfloat16)
    if P_pad != P:
        pat = jnp.pad(pat, ((0, 0), (0, 0), (0, P_pad - P)))
    w_t = weight.reshape(C_out, K).astype(jnp.bfloat16)            # (C_out, K)

    grid = (N, P_pad // TILE_P)
    vmem_limit = 48 * 1024 * 1024

    # ---- Pass 1: ReLU -> conv (transposed, lane-dense, bf16) + BN stat accumulation.
    y_t, sums, ssqs = pl.pallas_call(
        _conv_stats_kernel,
        grid=grid,
        in_specs=[
            pl.BlockSpec((C_out, K), lambda n, p: (0, 0)),             # weight, resident
            pl.BlockSpec((1, K, TILE_P), lambda n, p: (n, 0, p)),      # patches
        ],
        out_specs=(
            pl.BlockSpec((1, C_out, TILE_P), lambda n, p: (n, 0, p)),  # y^T tiles (bf16)
            pl.BlockSpec((1, C_out, 1), lambda n, p: (n, 0, 0)),       # per-sample sum
            pl.BlockSpec((1, C_out, 1), lambda n, p: (n, 0, 0)),       # per-sample sumsq
        ),
        out_shape=(
            jax.ShapeDtypeStruct((N, C_out, P_pad), jnp.bfloat16),
            jax.ShapeDtypeStruct((N, C_out, 1), jnp.float32),
            jax.ShapeDtypeStruct((N, C_out, 1), jnp.float32),
        ),
        compiler_params=pltpu.CompilerParams(
            dimension_semantics=("parallel", "arbitrary"),
            vmem_limit_bytes=vmem_limit,
        ),
    )(w_t, pat)

    # ---- Global BN statistics (tiny per-channel math; padded columns are zero,
    # so divide by the true element count).
    m_true = jnp.float32(N * P)
    total_sum = jnp.sum(sums, axis=0)                   # (C_out, 1)
    total_ssq = jnp.sum(ssqs, axis=0)
    mean = total_sum / m_true
    var = jnp.maximum(total_ssq / m_true - mean * mean, 0.0)
    scale = gamma.reshape(C_out, 1).astype(jnp.float32) * lax.rsqrt(var + eps)
    shift = beta.reshape(C_out, 1).astype(jnp.float32) - mean * scale

    # ---- Pass 2: apply normalization (fully parallel, lane-dense f32 stores).
    out_t = pl.pallas_call(
        _bn_apply_kernel,
        grid=grid,
        in_specs=[
            pl.BlockSpec((C_out, 1), lambda n, p: (0, 0)),             # scale, resident
            pl.BlockSpec((C_out, 1), lambda n, p: (0, 0)),             # shift, resident
            pl.BlockSpec((1, C_out, TILE_P), lambda n, p: (n, 0, p)),  # y^T (bf16)
        ],
        out_specs=pl.BlockSpec((1, C_out, TILE_P), lambda n, p: (n, 0, p)),
        out_shape=jax.ShapeDtypeStruct((N, C_out, P_pad), jnp.float32),
        compiler_params=pltpu.CompilerParams(
            dimension_semantics=("parallel", "parallel"),
            vmem_limit_bytes=vmem_limit,
        ),
    )(scale, shift, y_t)

    # (N, C_out, P) is already NCHW-flat: drop padding and reshape (no transpose).
    return out_t[:, :, :P].reshape(N, C_out, H_out, W_out)


def _reference(x, weight, gamma, beta, *, stride=1, padding=1, eps=1e-5):
    """Pure-JAX reference of ReLU -> Conv2d(no bias) -> BatchNorm2d(training)."""
    xr = jnp.maximum(x, 0.0)
    y = lax.conv_general_dilated(
        xr, weight, window_strides=(stride, stride),
        padding=((padding, padding), (padding, padding)),
        dimension_numbers=("NCHW", "OIHW", "NCHW"),
        preferred_element_type=jnp.float32,
    )
    mean = jnp.mean(y, axis=(0, 2, 3), keepdims=True)
    var = jnp.mean((y - mean) ** 2, axis=(0, 2, 3), keepdims=True)
    yh = (y - mean) * lax.rsqrt(var + eps)
    return yh * gamma.reshape(1, -1, 1, 1) + beta.reshape(1, -1, 1, 1)


if __name__ == "__main__":
    # StdConv(C_in=4, C_out=8, kernel_size=3, stride=1, padding=1, affine=True)
    N, C_in, H, W = 2, 4, 16, 16
    C_out, ksize, stride, padding = 8, 3, 1, 1

    key = jax.random.PRNGKey(0)
    kx, kw = jax.random.split(key)
    x = jax.random.normal(kx, (N, C_in, H, W), dtype=jnp.float32)
    weight = jax.random.normal(kw, (C_out, C_in, ksize, ksize), dtype=jnp.float32) * 0.1
    gamma = jnp.ones((C_out,), dtype=jnp.float32)   # nn.BatchNorm2d affine default init
    beta = jnp.zeros((C_out,), dtype=jnp.float32)

    out = stdconv_forward(x, weight, gamma, beta, stride=stride, padding=padding)
    out = jax.block_until_ready(out)

    ref = _reference(x, weight, gamma, beta, stride=stride, padding=padding)
    assert out.shape == (N, C_out, H, W), out.shape
    # bf16 MXU operands + bf16 intermediate -> looser tolerance than pure-f32.
    assert jnp.allclose(out, ref, rtol=2e-2, atol=2e-2), "mismatch vs reference"

    print("KERNEL_OK")
</pallas_src>

<mosaic_0001>
module attributes {stable_mosaic.version = 11 : i64} {
  func.func @_conv_stats_kernel(%arg0: i32, %arg1: i32, %arg2: memref<8x36xbf16, #tpu.memory_space<vmem>>, %arg3: memref<1x36x256xbf16, #tpu.memory_space<vmem>>, %arg4: memref<1x8x256xbf16, #tpu.memory_space<vmem>>, %arg5: memref<1x8x1xf32, #tpu.memory_space<vmem>>, %arg6: memref<1x8x1xf32, #tpu.memory_space<vmem>>) attributes {dimension_semantics = [#tpu.dimension_semantics<parallel>, #tpu.dimension_semantics<arbitrary>], iteration_bounds = array<i64: 2, 1>, scalar_prefetch = 0 : i64, scratch_operands = 0 : i64, tpu.core_type = #tpu.core_type<tc>, window_params = [{pipeline_mode = #tpu.pipeline_mode<synchronous>, transform_indices = @transform_0, window_bounds = array<i64: 8, 36>}, {transform_indices = @transform_1, window_bounds = array<i64: 1, 36, 256>}, {transform_indices = @transform_2, window_bounds = array<i64: 1, 8, 256>}, {transform_indices = @transform_3, window_bounds = array<i64: 1, 8, 1>}, {transform_indices = @transform_4, window_bounds = array<i64: 1, 8, 1>}]} {
    %c0 = arith.constant 0 : index
    %c0_0 = arith.constant 0 : index
    %c0_1 = arith.constant 0 : index
    %0 = vector.load %arg3[%c0, %c0_0, %c0_1] : memref<1x36x256xbf16, #tpu.memory_space<vmem>>, vector<1x36x256xbf16>
    %1 = vector.shape_cast %0 : vector<1x36x256xbf16> to vector<36x256xbf16>
    %cst = arith.constant 0.000000e+00 : bf16
    %2 = vector.broadcast %cst : bf16 to vector<36x256xbf16>
    %3 = arith.maximumf %1, %2 : vector<36x256xbf16>
    %c0_2 = arith.constant 0 : index
    %c0_3 = arith.constant 0 : index
    %4 = vector.load %arg2[%c0_2, %c0_3] : memref<8x36xbf16, #tpu.memory_space<vmem>>, vector<8x36xbf16>
    %cst_4 = arith.constant dense<0.000000e+00> : vector<8x256xf32>
    %5 = tpu.matmul %4, %3, %cst_4 {dimension_numbers = #tpu.dot_dimension_numbers<[1], [0], [0], [1], [0, 0, 1, 1], [], []>} : vector<8x36xbf16>, vector<36x256xbf16>, vector<8x256xf32> -> vector<8x256xf32>
    %6 = arith.truncf %5 : vector<8x256xf32> to vector<8x256xbf16>
    %c0_5 = arith.constant 0 : index
    %c0_6 = arith.constant 0 : index
    %c0_7 = arith.constant 0 : index
    %7 = vector.load %arg4[%c0_5, %c0_6, %c0_7] : memref<1x8x256xbf16, #tpu.memory_space<vmem>>, vector<1x8x256xbf16>
    %8 = vector.shape_cast %7 : vector<1x8x256xbf16> to vector<8x256xbf16>
    %9 = vector.shape_cast %6 : vector<8x256xbf16> to vector<1x8x256xbf16>
    tpu.vector_store %arg4[%c0_5, %c0_6, %c0_7], %9 {strides = array<i32>} : memref<1x8x256xbf16, #tpu.memory_space<vmem>>, vector<1x8x256xbf16>,
    %cst_8 = arith.constant dense<0.000000e+00> : vector<8xf32>
    %10 = vector.multi_reduction <add>, %5, %cst_8 [1] : vector<8x256xf32> to vector<8xf32>
    %11 = vector.shape_cast %10 : vector<8xf32> to vector<8x1xf32>
    %12 = arith.mulf %5, %5 : vector<8x256xf32>
    %cst_9 = arith.constant dense<0.000000e+00> : vector<8xf32>
    %13 = vector.multi_reduction <add>, %12, %cst_9 [1] : vector<8x256xf32> to vector<8xf32>
    %14 = vector.shape_cast %13 : vector<8xf32> to vector<8x1xf32>
    %c0_i32 = arith.constant 0 : i32
    %15 = arith.cmpi eq, %arg1, %c0_i32 : i32
    %16 = arith.extui %15 : i1 to i32
    %c0_i32_10 = arith.constant 0 : i32
    %17 = arith.cmpi ne, %16, %c0_i32_10 : i32
    scf.if %17 {
      %cst_23 = arith.constant 0.000000e+00 : f32
      %30 = vector.broadcast %cst_23 : f32 to vector<8x1xf32>
      %c0_24 = arith.constant 0 : index
      %c0_25 = arith.constant 0 : index
      %c0_26 = arith.constant 0 : index
      %31 = vector.load %arg5[%c0_24, %c0_25, %c0_26] : memref<1x8x1xf32, #tpu.memory_space<vmem>>, vector<1x8x1xf32>
      %32 = vector.shape_cast %31 : vector<1x8x1xf32> to vector<8x1xf32>
      %33 = vector.shape_cast %30 : vector<8x1xf32> to vector<1x8x1xf32>
      tpu.vector_store %arg5[%c0_24, %c0_25, %c0_26], %33 {strides = array<i32>} : memref<1x8x1xf32, #tpu.memory_space<vmem>>, vector<1x8x1xf32>,
      %cst_27 = arith.constant 0.000000e+00 : f32
      %34 = vector.broadcast %cst_27 : f32 to vector<8x1xf32>
      %c0_28 = arith.constant 0 : index
      %c0_29 = arith.constant 0 : index
      %c0_30 = arith.constant 0 : index
      %35 = vector.load %arg6[%c0_28, %c0_29, %c0_30] : memref<1x8x1xf32, #tpu.memory_space<vmem>>, vector<1x8x1xf32>
      %36 = vector.shape_cast %35 : vector<1x8x1xf32> to vector<8x1xf32>
      %37 = vector.shape_cast %34 : vector<8x1xf32> to vector<1x8x1xf32>
      tpu.vector_store %arg6[%c0_28, %c0_29, %c0_30], %37 {strides = array<i32>} : memref<1x8x1xf32, #tpu.memory_space<vmem>>, vector<1x8x1xf32>,
    } else {
    }
    %c0_11 = arith.constant 0 : index
    %c0_12 = arith.constant 0 : index
    %c0_13 = arith.constant 0 : index
    %18 = vector.load %arg5[%c0_11, %c0_12, %c0_13] : memref<1x8x1xf32, #tpu.memory_space<vmem>>, vector<1x8x1xf32>
    %19 = vector.shape_cast %18 : vector<1x8x1xf32> to vector<8x1xf32>
    %20 = arith.addf %19, %11 : vector<8x1xf32>
    %c0_14 = arith.constant 0 : index
    %c0_15 = arith.constant 0 : index
    %c0_16 = arith.constant 0 : index
    %21 = vector.load %arg5[%c0_14, %c0_15, %c0_16] : memref<1x8x1xf32, #tpu.memory_space<vmem>>, vector<1x8x1xf32>
    %22 = vector.shape_cast %21 : vector<1x8x1xf32> to vector<8x1xf32>
    %23 = vector.shape_cast %20 : vector<8x1xf32> to vector<1x8x1xf32>
    tpu.vector_store %arg5[%c0_14, %c0_15, %c0_16], %23 {strides = array<i32>} : memref<1x8x1xf32, #tpu.memory_space<vmem>>, vector<1x8x1xf32>,
    %c0_17 = arith.constant 0 : index
    %c0_18 = arith.constant 0 : index
    %c0_19 = arith.constant 0 : index
    %24 = vector.load %arg6[%c0_17, %c0_18, %c0_19] : memref<1x8x1xf32, #tpu.memory_space<vmem>>, vector<1x8x1xf32>
    %25 = vector.shape_cast %24 : vector<1x8x1xf32> to vector<8x1xf32>
    %26 = arith.addf %25, %14 : vector<8x1xf32>
    %c0_20 = arith.constant 0 : index
    %c0_21 = arith.constant 0 : index
    %c0_22 = arith.constant 0 : index
    %27 = vector.load %arg6[%c0_20, %c0_21, %c0_22] : memref<1x8x1xf32, #tpu.memory_space<vmem>>, vector<1x8x1xf32>
    %28 = vector.shape_cast %27 : vector<1x8x1xf32> to vector<8x1xf32>
    %29 = vector.shape_cast %26 : vector<8x1xf32> to vector<1x8x1xf32>
    tpu.vector_store %arg6[%c0_20, %c0_21, %c0_22], %29 {strides = array<i32>} : memref<1x8x1xf32, #tpu.memory_space<vmem>>, vector<1x8x1xf32>,
    return
  }
  func.func @transform_0(%arg0: i32, %arg1: i32) -> (i32, i32) {
    %c0_i32 = arith.constant 0 : i32
    %c0_i32_0 = arith.constant 0 : i32
    %c0_i32_1 = arith.constant 0 : i32
    return %c0_i32, %c0_i32_0 : i32, i32
  }
  func.func @transform_1(%arg0: i32, %arg1: i32) -> (i32, i32, i32) {
    %c0_i32 = arith.constant 0 : i32
    %c0_i32_0 = arith.constant 0 : i32
    return %arg0, %c0_i32, %arg1 : i32, i32, i32
  }
  func.func @transform_2(%arg0: i32, %arg1: i32) -> (i32, i32, i32) {
    %c0_i32 = arith.constant 0 : i32
    %c0_i32_0 = arith.constant 0 : i32
    return %arg0, %c0_i32, %arg1 : i32, i32, i32
  }
  func.func @transform_3(%arg0: i32, %arg1: i32) -> (i32, i32, i32) {
    %c0_i32 = arith.constant 0 : i32
    %c0_i32_0 = arith.constant 0 : i32
    %c0_i32_1 = arith.constant 0 : i32
    return %arg0, %c0_i32, %c0_i32_0 : i32, i32, i32
  }
  func.func @transform_4(%arg0: i32, %arg1: i32) -> (i32, i32, i32) {
    %c0_i32 = arith.constant 0 : i32
    %c0_i32_0 = arith.constant 0 : i32
    %c0_i32_1 = arith.constant 0 : i32
    return %arg0, %c0_i32, %c0_i32_0 : i32, i32, i32
  }
}

</mosaic_0001>

<bundles_post_ra>
// kernel: tpu_custom_call.1
= control target key start
LH: loop header
LB: loop body
LE: loop exit
PB: predicated region body
PF: predicated region fallthrough
CT: control target
= control target key end

     0   :  { %10 = vsyncpa [#allocation3], 0  ;;  %s847_s0 = inlined_call_operand.vmem [shape: bf16[8,36], index: 0, kind: input, shape index: {}]   ;;  %s848_s1 = inlined_call_operand.vmem [shape: bf16[2,36,256], index: 1, kind: input, shape index: {}]   ;;  %s849_s2 = inlined_call_operand.hbm [shape: bf16[2,8,256], index: 2, kind: output, shape index: {0}]   ;;  %s850_s3 = inlined_call_operand.vmem [shape: f32[2,8,1], index: 3, kind: output, shape index: {1}]   ;;  %s851_s4 = inlined_call_operand.vmem [shape: f32[2,8,1], index: 4, kind: output, shape index: {2}]  }
   0x1   :  { %12 = vsyncpa [#allocation3 + $0x1], 0  ;;  %s714_s15 = smov 0   ;;  %s716_s16 = smov 0  }
   0x2   :  { %s718_s17 = smov 0   ;;  %s720_s18 = smov 0  }
   0x3   :  { %s722_s19 = smov 0   ;;  %s724_s20 = smov 0  }
   0x4 LB: > { %s523_s21 = sadd.s32 4294967295, %s684_s20   ;;  %s524_s22 = sadd.s32 4294967294, %s684_s20   ;;  %s684_s20 = sphi %s724_s20, %s18_s20   ;;  %s680_s19 = sphi %s722_s19, %s858_s19   ;;  %s676_s18 = sphi %s720_s18, %s857_s18   ;;  %s672_s17 = sphi %s718_s17, %s856_s17   ;;  %s668_s16 = sphi %s716_s16, %s855_s16   ;;  %s664_s15 = sphi %s714_s15, %s854_s15  }
   0x5   : > { %s30_s23 = sadd.s32 1, %s680_s19  ;;  %s88_s24 = sadd.s32 1, %s672_s17 }
   0x6   : > { %p32_p0 = scmp.ge.s32.totalorder %s30_s23, 2  ;;  %p98_p1 = scmp.ne.s32.totalorder %s672_s17, %s668_s16 }
   0x7   : > { %p99_p2 = scmp.eq.s32.totalorder %s523_s21, 1  ;;  %p104_p3 = scmp.ne.s32.totalorder %s668_s16, %s664_s15 }
   0x8   : > { %s860_s23 = smov (%p32_p0, %s30_s23), 0  ;;  %p105_p5 = scmp.eq.s32.totalorder %s524_s22, 1 }
   0x9   : > { %p754_p4 = por %p99_p2, %p98_p1  ;;  %s83_s26 = ssub.s32 %s680_s19, %s860_s23 }
   0xa   : > { %p527_p6 = scmp.ge.s32.totalorder %s684_s20, 1  ;;  %p86_p7 = scmp.eq.s32.totalorder %s83_s26, 0 }
   0xb   : > { %p761_p8 = por %p105_p5, %p104_p3  ;;  %p191_p9 = scmp.lt.s32.totalorder %s684_s20, 3 }
   0xc   : > { %s767_s28 = scalar_select %p86_p7, %s672_s17, %s88_s24  }
   0xd   : > { %p192_p10 = pnand %p527_p6, %p191_p9 }
   0xe   : > { %p230_p11 = scmp.lt.s32.totalorder (!%p192_p10), %s676_s18, 1  ;;  %v686_v0 = vmov (!%p192_p10), 0   ;;  %vm289_vm0 = vcmask (!%p192_p10), 1041408   ;;  %v259_v18 = vld [vmem:[%s847_s0] sm:$0xf] (!%p192_p10)  ;;  %vm285_vm1 = vcmask (!%p192_p10), 293888  }
   0xf   : > { %195 = sbr.rel (%p192_p10) target bundleno = 408 (0x198), region = 28  ;;  %328 = vmatprep.mubr.bf16.mxu0 (!%p192_p10), %v686_v0  ;;  %vm358_vm2 = vcmask (!%p192_p10), 7168   ;;  %v687_v19 = vmov (!%p192_p10), 0.0   ;;  %s214_s14 = sand.u32 (!%p192_p10), 1, %s668_s16  }
  0x10   : > { %s528_s21 = sshll.u32 (!%p192_p10), %s214_s14, 3  ;;  %s369_s9 = scalar_lea.sflag (!%p192_p10), [#allocation3], %s214_s14 }
  0x11   : > { %s216_s22 = scalar_lea.vmem (!%p192_p10), [#allocation2], %s528_s21  ;;  %s688_s12 = smov (!%p192_p10), [#allocation2]  }
  0x12   : > { %s393_s5 = sshll.u32 (!%p192_p10), %s216_s22, 4  ;;  %s394_s5 = int_to_ptr.vmem [resolvable:$true] %s393_s5 }
  0x13   : > { %s606_s11 = scalar_lea.vmem (!%p192_p10), %s394_s5, 128 }
  0x14   : > { %p607_p12 = scmp.ne.s32.totalorder (!%p192_p10), %s394_s5, %s606_s11 }
  0x16   : > { %s771_s29 = scalar_select %p230_p11, %s676_s18, 1 }
  0x17   : > { %p608_p13 = pnand %p607_p12, %p754_p4 }
  0x18   : > { %s548_s30 = smul.u32 40, %s771_s29  ;;  %s530_s10 = sshll.u32 %s771_s29, 3 }
  0x19   : > { %s784_s13 = scalar_lea.vmem %s850_s3, %s530_s10  ;;  %s792_s29 = scalar_lea.vmem %s851_s4, %s530_s10 }
  0x1a   : > { %s237_s7 = scalar_lea.vmem %s848_s1, %s548_s30  ;;  %359 = vst.msk [vmem:[%s784_s13] sm:$0xff] %vm358_vm2, %v687_v19  ;;  %360 = vst.msk [vmem:[%s792_s29] sm:$0xff] %vm358_vm2, %v687_v19  ;;  %s547_s30 = sshll.u32 %s676_s18, 7 }
  0x1b   : > { %v249_v1 = vld [vmem:[%s237_s7] sm:$0xff]  ;;  %v250_v2 = vld [vmem:[%s237_s7 + $0x8] sm:$0xff]  ;;  %v251_v3 = vld [vmem:[%s237_s7 + $0x10] sm:$0xff]  ;;  %s800_s8 = scalar_lea.hbm %s849_s2, %s547_s30  ;;  %p609_p0 = pneg %p608_p13 }
  0x1c   : > { %v254_v4 = vmax.bf16 %v686_v0, %v249_v1  ;;  %v255_v5 = vmax.bf16 %v686_v0, %v250_v2  ;;  %v252_v6 = vld [vmem:[%s237_s7 + $0x18] sm:$0xff]  ;;  %v256_v7 = vmax.bf16 %v686_v0, %v251_v3  ;;  %v253_v8 = vld [vmem:[%s237_s7 + $0x20] sm:$0x33]  ;;  %s610_s10 = sshll.u32 %s688_s12, 4  ;;  %s611_s10 = int_to_ptr.vmem [resolvable:$false] %s610_s10 }
  0x1d   : > { %v257_v9 = vmax.bf16 %v686_v0, %v252_v6  ;;  %v258_v12 = vmax.bf16 %v686_v0, %v253_v8  ;;  %s612_s21 = scalar_lea.vmem %s611_s10, 256  ;;  %p613_p1 = scmp.lt.s32.totalorder %s394_s5, %s611_s10 }
  0x1e   : > { %v533_v10 = vcombine.high %v254_v4, %v255_v5  ;;  %v532_v11 = vcombine.low %v254_v4, %v255_v5  ;;  %p614_p2 = scmp.lt.s32.totalorder %s612_s21, %s606_s11 }
  0x1f   : > { %v535_v13 = vcombine.high %v256_v7, %v257_v9  ;;  %v534_v14 = vcombine.low %v256_v7, %v257_v9  ;;  %v537_v15 = vcombine.high %v258_v12, %v258_v12  ;;  %v536_v16 = vcombine.low %v258_v12, %v258_v12 }
  0x20   : > { %296 = vmatprep.subr.bf16.mxu0 %v533_v10  ;;  %p615_p3 = por %p614_p2, %p613_p1 }
  0x21   : > { %297 = vmatpush1.bf16.msra.mxu0 %v532_v11  ;;  %v291_v17 = vsel %vm289_vm0, %v536_v16, 0 }
  0x22   : > { %298 = vmatprep.subr.bf16.mxu0 %v535_v13  ;;  %p616_p5 = pnand %p615_p3, %p609_p0 }
  0x25   : > { %299 = vmatpush1.bf16.msra.mxu0 %v534_v14 }
  0x26   : > { %538 = vmatprep.subr.msk.bf16.mxu0 %vm289_vm0, %v537_v15 }
  0x29   : > { %301 = vmatpush1.bf16.msra.mxu0 %v291_v17 }
  0x2c   : > { %539 = vmatmul.mubr.msk.bf16.vlgmr.msra.gmra.mrb[0].mxu0 %vm285_vm1, %v259_v18 }
  0xff   : > { %v330_v20 = vpop.f32.mrb[0].mxu0 }
 0x100   : > { %v332_v21 = vpop.f32.mrb[1].mxu0  ;;  %v349_v22 = vmul.f32 %v330_v20, %v330_v20 }
 0x101   : > { %v546_v23 = vpack.c.bf16 %v332_v21, %v330_v20  ;;  %v334_v24 = vpop.f32.mrb[2].mxu0  ;;  %v346_v25 = vadd.f32 %v332_v21, %v330_v20  ;;  %v350_v26 = vmul.f32 %v332_v21, %v332_v21 }
 0x102   : > { %v335_v27 = vpop.f32.mrb[3].mxu0 }
 0x103   : > { %347 = vadd.xlane.f32.xlu0 %v346_v25  ;;  %v351_v28 = vadd.f32 %v350_v26, %v349_v22  ;;  %345 = vst [vmem:[%s216_s22] sm:$0xff] %v546_v23 }
 0x107   : > { %352 = vadd.xlane.f32.xlu0 %v351_v28 }
 0x108   : > { %619 = shalt.err (!%p616_p5)
}
 0x109   : > { %s620_s18 = scalar_lea.hbm %s800_s8, 128  ;;  %s624_s24 = scalar_lea.hbm %s849_s2, 256 }
 0x10a   : > { %p621_p6 = scmp.ne.s32.totalorder %s800_s8, %s620_s18  ;;  %p625_p10 = scmp.lt.u32.totalorder %s800_s8, %s849_s2 }
 0x10b   : > { %p626_p11 = scmp.lt.u32.totalorder %s624_s24, %s620_s18  ;;  %p628_p13 = scmp.lt.u32.totalorder %s620_s18, %s800_s8 }
 0x10c   : > { %p622_p7 = pnand %p621_p6, %p754_p4 }
 0x10d   : > { %p627_p12 = por %p626_p11, %p625_p10 }
 0x10e   : > { %p623_p9 = pneg %p622_p7 }
 0x10f   : > { %p629_p0 = por %p628_p13, %p627_p12 }
 0x111   : > { %p630_p1 = pnand %p629_p0, %p623_p9 }
 0x113   : > { %633 = shalt.err (!%p630_p1)
}
 0x114   : > { %549 = dma.vmem_to_hbm [thread:$0]  (%p754_p4), %s394_s5, 128, %s800_s8, %s369_s9   ;;  %v361_v29 = vld [vmem:[%s784_s13] sm:$0xff] }
 0x115   : > { %v365_v32 = vld [vmem:[%s792_s29] sm:$0xff] }
 0x190   : > { %v348_v30 = vpop.xlane.xlu0 %347 }
 0x191   : > { %v362_v31 = vadd.f32 %v361_v29, %v348_v30 }
 0x193   : > { %364 = vst.msk [vmem:[%s784_s13] sm:$0xff] %vm358_vm2, %v362_v31 }
 0x194   : > { %v353_v33 = vpop.xlane.xlu0 %352 }
 0x195   : > { %v366_v34 = vadd.f32 %v365_v32, %v353_v33 }
 0x197   : > { %367 = vst.msk [vmem:[%s792_s29] sm:$0xff] %vm358_vm2, %v366_v34 }
 0x198 PF: > { %p555_p2 = scmp.ge.s32.totalorder %s684_s20, 2  ;;  %s411_s25 = sand.u32 1, %s664_s15  }
 0x199   : > { %s412_s6 = scalar_lea.sflag [#allocation3], %s411_s25 }
 0x19a   : > { %p552_p3 = pnand %p555_p2, %p761_p8 }
 0x19c   : > { %659 = dma.done.wait (!%p552_p3), %s412_s6, 128  }
 0x19d   : > { %661 = vsyncadd (!%p552_p3), %s412_s6, 4294967168  ;;  %s18_s20 = sadd.s32 1, %s684_s20   ;;  %s854_s15 = smov %s668_s16 }
 0x19e   : > { %p15_p4 = scmp.ge.s32.totalorder %s18_s20, 4   ;;  %s855_s16 = smov %s672_s17 }
 0x19f   : > { %s856_s17 = smov %s767_s28  ;;  %s857_s18 = smov %s680_s19 }
 0x1a0   : > { %s858_s19 = smov %s860_s23  ;;  %17 = sbr.rel (!%p15_p4) target bundleno = 4 (0x4), region = 91 }
 0x1a7   :  { %431 = vsyncpa [#allocation3], 1 }
 0x1a8   :  { %433 = vsyncpa [#allocation3 + $0x1], 1 }

</bundles_post_ra>
